<compile_context>
chip_gen: v7x
topology: tpu7x:2x2x1
jax: 0.10.0
libtpu: 0.0.40
codegen_flags: <defaults>
</compile_context>

<pallas_src>
import jax
import jax.numpy as jnp
from jax.experimental import pallas as pl
from jax.experimental.pallas import tpu as pltpu

# ----------------------------- configuration -------------------------------
B = 2                      # batch
H = W = 16                 # input_resolution
C = 64                     # dim
HH, WH = H // 2, W // 2
M = B * HH * WH            # number of merged tokens           = 128
C2 = 2 * C                 # output channels                   = 128
C4 = 4 * C                 # LayerNorm width                   = 256
EPS = 1e-5
f32 = jnp.float32
bf16 = jnp.bfloat16

GRID = 2                   # "parallel" steps over the token dim (2 TCs on v7x)
TR = (B * HH) // GRID      # input row-pairs handled per grid step
TM = TR * WH               # merged tokens handled per grid step
# TODO(synk): for real Swin shapes (56x56, C>=96) pick TM per generation so the
# double-buffered input tile stays inside v7x's 32 MiB scoped VMEM default and
# output tiles are >=512 rows; at this toy size everything fits trivially.


# ------------------------------- kernel -------------------------------------
def patch_merging_kernel(x_ref, w_ref, b_ref, o_ref):
    # x_ref: (TR, 2, WH, 2C) -- parity dim splits even/odd image rows,
    #                           lane dim holds [col-even C | col-odd C].
    # Ref-level slices on the (cheap) major parity dim; the reshape is a free
    # re-view because WH == f32 sublane tile and C2 == lane width.
    xe = x_ref[:, 0, :, :].reshape(TM, C2)   # even image rows: features [x0 | x2]
    xo = x_ref[:, 1, :, :].reshape(TM, C2)   # odd  image rows: features [x1 | x3]

    # LayerNorm stats over the (virtual) 4C feature dim, biased variance, f32.
    inv4c = 1.0 / C4
    mu = (jnp.sum(xe, axis=-1, keepdims=True)
          + jnp.sum(xo, axis=-1, keepdims=True)) * inv4c
    de = xe - mu
    do = xo - mu
    var = (jnp.sum(de * de, axis=-1, keepdims=True)
           + jnp.sum(do * do, axis=-1, keepdims=True)) * inv4c
    rstd = jax.lax.rsqrt(var + EPS)

    # gamma is folded into w_ref, beta into b_ref.  Lane-concat at a 128
    # boundary is layout-preserving; one K=4C bf16 MXU dot, f32 accumulate.
    h = jnp.concatenate([de * rstd, do * rstd], axis=-1).astype(bf16)   # (TM, 4C)
    o_ref[...] = (jnp.dot(h, w_ref[...], preferred_element_type=jnp.float32)
                  + b_ref[...])


# ------------------------------ wrapper --------------------------------------
def _permute_rows(v):
    """Reorder params from torch.cat feature order [x0|x1|x2|x3] to the
    kernel's gather order [x0|x2|x1|x3] (even-row features first)."""
    return jnp.concatenate([v[0:C], v[2 * C:3 * C], v[C:2 * C], v[3 * C:4 * C]],
                           axis=0)


@jax.jit
def patch_merging(x, gamma4, beta4, w_full):
    """x: (B, H*W, C); gamma4, beta4: (4C,); w_full: (4C, 2C) = W.T of nn.Linear."""
    # Guards for the layout trick: the reshape below is only relayout-free when
    # W/2 is a multiple of the f32 sublane tile (8) and 2C is a multiple of the
    # lane width (128).
    assert H % 2 == 0 and W % 2 == 0, "PatchMerging requires even H, W"
    assert WH % 8 == 0, "free-reshape gather requires (W/2) % 8 == 0"
    assert C2 % 128 == 0, "lane-dense packing requires (2*C) % 128 == 0"
    assert (B * HH) % GRID == 0

    # Free (flat-order preserving) view exposing row parity + column-pair lanes.
    xv = x.reshape(B * HH, 2, WH, C2)

    # Pre-folded constants (in real use computed once at init and cached):
    #   out = (d * rstd) @ (diag(gamma_perm) @ W_perm) + beta @ W
    w_scaled = (_permute_rows(gamma4)[:, None] * _permute_rows(w_full)).astype(bf16)
    bias = jnp.dot(beta4, w_full,
                   precision=jax.lax.Precision.HIGHEST).reshape(1, C2).astype(f32)

    out = pl.pallas_call(
        patch_merging_kernel,
        out_shape=jax.ShapeDtypeStruct((M, C2), f32),
        grid=(GRID,),
        in_specs=[
            pl.BlockSpec((TR, 2, WH, C2), lambda i: (i, 0, 0, 0)),
            pl.BlockSpec((C4, C2), lambda i: (0, 0)),
            pl.BlockSpec((1, C2), lambda i: (0, 0)),
        ],
        out_specs=pl.BlockSpec((TM, C2), lambda i: (i, 0)),
        compiler_params=pltpu.CompilerParams(
            dimension_semantics=("parallel",)),
    )(xv, w_scaled, bias)

    return out.reshape(B, HH * WH, C2)


# --------------------------- pure-JAX reference -------------------------------
def patch_merging_reference(x, gamma4, beta4, w_full):
    xB = x.reshape(B, H, W, C)
    x0 = xB[:, 0::2, 0::2, :]
    x1 = xB[:, 1::2, 0::2, :]
    x2 = xB[:, 0::2, 1::2, :]
    x3 = xB[:, 1::2, 1::2, :]
    xc = jnp.concatenate([x0, x1, x2, x3], axis=-1).reshape(B, -1, C4)
    mu = jnp.mean(xc, axis=-1, keepdims=True)
    var = jnp.mean((xc - mu) ** 2, axis=-1, keepdims=True)
    xn = (xc - mu) * jax.lax.rsqrt(var + EPS) * gamma4 + beta4
    return jnp.dot(xn, w_full, precision=jax.lax.Precision.HIGHEST)


# -------------------------------- main ----------------------------------------
if __name__ == "__main__":
    key = jax.random.PRNGKey(0)
    kx, kg, kb, kw = jax.random.split(key, 4)
    x = jax.random.normal(kx, (B, H * W, C), f32)                 # (2, 256, 64)
    gamma4 = 1.0 + 0.1 * jax.random.normal(kg, (C4,), f32)        # LN weight
    beta4 = 0.1 * jax.random.normal(kb, (C4,), f32)               # LN bias
    w_full = 0.02 * jax.random.normal(kw, (C4, C2), f32)          # Linear W.T

    out = patch_merging(x, gamma4, beta4, w_full)
    out = jax.block_until_ready(out)

    ref = patch_merging_reference(x, gamma4, beta4, w_full)

    assert out.shape == (B, HH * WH, C2), out.shape
    assert bool(jnp.all(jnp.isfinite(out)))
    # bf16 MXU operands with f32 accumulation (deliberate choice, see header):
    # expected max abs error vs the f32-HIGHEST reference is a few 1e-3.
    max_err = float(jnp.max(jnp.abs(out - ref)))
    assert max_err < 2e-2, f"max abs err vs reference: {max_err}"
    print("KERNEL_OK")
</pallas_src>

<mosaic_0001>
module attributes {stable_mosaic.version = 11 : i64} {
  func.func @patch_merging_kernel(%arg0: i32, %arg1: memref<8x2x8x128xf32, #tpu.memory_space<vmem>>, %arg2: memref<256x128xbf16, #tpu.memory_space<vmem>>, %arg3: memref<1x128xf32, #tpu.memory_space<vmem>>, %arg4: memref<64x128xf32, #tpu.memory_space<vmem>>) attributes {dimension_semantics = [#tpu.dimension_semantics<parallel>], iteration_bounds = array<i64: 2>, scalar_prefetch = 0 : i64, scratch_operands = 0 : i64, tpu.core_type = #tpu.core_type<tc>, window_params = [{transform_indices = @transform_0, window_bounds = array<i64: 8, 2, 8, 128>}, {pipeline_mode = #tpu.pipeline_mode<synchronous>, transform_indices = @transform_1, window_bounds = array<i64: 256, 128>}, {pipeline_mode = #tpu.pipeline_mode<synchronous>, transform_indices = @transform_2, window_bounds = array<i64: 1, 128>}, {transform_indices = @transform_3, window_bounds = array<i64: 64, 128>}]} {
    %c0 = arith.constant 0 : index
    %c0_0 = arith.constant 0 : index
    %c0_1 = arith.constant 0 : index
    %c0_2 = arith.constant 0 : index
    %0 = vector.load %arg1[%c0, %c0_0, %c0_1, %c0_2] : memref<8x2x8x128xf32, #tpu.memory_space<vmem>>, vector<8x1x8x128xf32>
    %1 = vector.shape_cast %0 : vector<8x1x8x128xf32> to vector<8x8x128xf32>
    %2 = vector.shape_cast %1 : vector<8x8x128xf32> to vector<64x128xf32>
    %c0_3 = arith.constant 0 : index
    %c1 = arith.constant 1 : index
    %c0_4 = arith.constant 0 : index
    %c0_5 = arith.constant 0 : index
    %3 = vector.load %arg1[%c0_3, %c1, %c0_4, %c0_5] : memref<8x2x8x128xf32, #tpu.memory_space<vmem>>, vector<8x1x8x128xf32>
    %4 = vector.shape_cast %3 : vector<8x1x8x128xf32> to vector<8x8x128xf32>
    %5 = vector.shape_cast %4 : vector<8x8x128xf32> to vector<64x128xf32>
    %cst = arith.constant dense<0.000000e+00> : vector<64xf32>
    %6 = vector.multi_reduction <add>, %2, %cst [1] : vector<64x128xf32> to vector<64xf32>
    %7 = vector.shape_cast %6 : vector<64xf32> to vector<64x1xf32>
    %cst_6 = arith.constant dense<0.000000e+00> : vector<64xf32>
    %8 = vector.multi_reduction <add>, %5, %cst_6 [1] : vector<64x128xf32> to vector<64xf32>
    %9 = vector.shape_cast %8 : vector<64xf32> to vector<64x1xf32>
    %10 = arith.addf %7, %9 : vector<64x1xf32>
    %cst_7 = arith.constant 3.906250e-03 : f32
    %11 = vector.broadcast %cst_7 : f32 to vector<64x1xf32>
    %12 = arith.mulf %10, %11 : vector<64x1xf32>
    %13 = vector.broadcast %12 : vector<64x1xf32> to vector<64x128xf32>
    %14 = arith.subf %2, %13 : vector<64x128xf32>
    %15 = vector.broadcast %12 : vector<64x1xf32> to vector<64x128xf32>
    %16 = arith.subf %5, %15 : vector<64x128xf32>
    %17 = arith.mulf %14, %14 : vector<64x128xf32>
    %cst_8 = arith.constant dense<0.000000e+00> : vector<64xf32>
    %18 = vector.multi_reduction <add>, %17, %cst_8 [1] : vector<64x128xf32> to vector<64xf32>
    %19 = vector.shape_cast %18 : vector<64xf32> to vector<64x1xf32>
    %20 = arith.mulf %16, %16 : vector<64x128xf32>
    %cst_9 = arith.constant dense<0.000000e+00> : vector<64xf32>
    %21 = vector.multi_reduction <add>, %20, %cst_9 [1] : vector<64x128xf32> to vector<64xf32>
    %22 = vector.shape_cast %21 : vector<64xf32> to vector<64x1xf32>
    %23 = arith.addf %19, %22 : vector<64x1xf32>
    %cst_10 = arith.constant 3.906250e-03 : f32
    %24 = vector.broadcast %cst_10 : f32 to vector<64x1xf32>
    %25 = arith.mulf %23, %24 : vector<64x1xf32>
    %cst_11 = arith.constant 9.99999974E-6 : f32
    %26 = vector.broadcast %cst_11 : f32 to vector<64x1xf32>
    %27 = arith.addf %25, %26 : vector<64x1xf32>
    %28 = math.rsqrt %27 : vector<64x1xf32>
    %29 = vector.broadcast %28 : vector<64x1xf32> to vector<64x128xf32>
    %30 = arith.mulf %14, %29 : vector<64x128xf32>
    %31 = vector.broadcast %28 : vector<64x1xf32> to vector<64x128xf32>
    %32 = arith.mulf %16, %31 : vector<64x128xf32>
    %33 = tpu.concatenate %30, %32 in 1 : vector<64x128xf32>, vector<64x128xf32> -> vector<64x256xf32>
    %34 = arith.truncf %33 : vector<64x256xf32> to vector<64x256xbf16>
    %c0_12 = arith.constant 0 : index
    %c0_13 = arith.constant 0 : index
    %35 = vector.load %arg2[%c0_12, %c0_13] : memref<256x128xbf16, #tpu.memory_space<vmem>>, vector<256x128xbf16>
    %cst_14 = arith.constant dense<0.000000e+00> : vector<64x128xf32>
    %36 = tpu.matmul %34, %35, %cst_14 {dimension_numbers = #tpu.dot_dimension_numbers<[1], [0], [0], [1], [0, 0, 1, 1], [], []>} : vector<64x256xbf16>, vector<256x128xbf16>, vector<64x128xf32> -> vector<64x128xf32>
    %c0_15 = arith.constant 0 : index
    %c0_16 = arith.constant 0 : index
    %37 = vector.load %arg3[%c0_15, %c0_16] : memref<1x128xf32, #tpu.memory_space<vmem>>, vector<1x128xf32>
    %38 = vector.broadcast %37 : vector<1x128xf32> to vector<64x128xf32>
    %39 = arith.addf %36, %38 : vector<64x128xf32>
    %c0_17 = arith.constant 0 : index
    %c0_18 = arith.constant 0 : index
    %40 = vector.load %arg4[%c0_17, %c0_18] : memref<64x128xf32, #tpu.memory_space<vmem>>, vector<64x128xf32>
    tpu.vector_store %arg4[%c0_17, %c0_18], %39 {strides = array<i32>} : memref<64x128xf32, #tpu.memory_space<vmem>>, vector<64x128xf32>,
    return
  }
  func.func @transform_0(%arg0: i32) -> (i32, i32, i32, i32) {
    %c0_i32 = arith.constant 0 : i32
    %c0_i32_0 = arith.constant 0 : i32
    %c0_i32_1 = arith.constant 0 : i32
    %c0_i32_2 = arith.constant 0 : i32
    return %arg0, %c0_i32, %c0_i32_0, %c0_i32_1 : i32, i32, i32, i32
  }
  func.func @transform_1(%arg0: i32) -> (i32, i32) {
    %c0_i32 = arith.constant 0 : i32
    %c0_i32_0 = arith.constant 0 : i32
    %c0_i32_1 = arith.constant 0 : i32
    return %c0_i32, %c0_i32_0 : i32, i32
  }
  func.func @transform_2(%arg0: i32) -> (i32, i32) {
    %c0_i32 = arith.constant 0 : i32
    %c0_i32_0 = arith.constant 0 : i32
    %c0_i32_1 = arith.constant 0 : i32
    return %c0_i32, %c0_i32_0 : i32, i32
  }
  func.func @transform_3(%arg0: i32) -> (i32, i32) {
    %c0_i32 = arith.constant 0 : i32
    %c0_i32_0 = arith.constant 0 : i32
    return %arg0, %c0_i32 : i32, i32
  }
}

</mosaic_0001>

<bundles_post_ra>
// kernel: patch_merging.1
= control target key start
LH: loop header
LB: loop body
LE: loop exit
PB: predicated region body
PF: predicated region fallthrough
CT: control target
= control target key end

     0   :  { %8 = vsyncpa [#allocation3], 0  ;;  %s1185_s0 = inlined_call_operand.vmem [shape: f32[16,2,8,128], index: 0, kind: input, shape index: {}]   ;;  %s1186_s1 = inlined_call_operand.vmem [shape: bf16[256,128], index: 1, kind: input, shape index: {}]   ;;  %s1187_s2 = inlined_call_operand.vmem [shape: f32[1,128], index: 2, kind: input, shape index: {}]   ;;  %s1188_s3 = inlined_call_operand.hbm [shape: f32[128,128], index: 3, kind: output, shape index: {}]  }
   0x1   :  { %10 = vsyncpa [#allocation3 + $0x1], 0  ;;  %s901_s12 = smov 0   ;;  %s903_s13 = smov 0  }
   0x2   :  { %s905_s14 = smov 0   ;;  %s907_s15 = smov 0  }
   0x3 LB: > { %s922_s16 = sadd.s32 4294967295, %s876_s15   ;;  %s645_s17 = sadd.s32 4294967294, %s876_s15   ;;  %s876_s15 = sphi %s907_s15, %s1194_s15   ;;  %s872_s14 = sphi %s905_s14, %s1193_s14   ;;  %s868_s13 = sphi %s903_s13, %s1192_s13   ;;  %s864_s12 = sphi %s901_s12, %s1191_s12  }
   0x4   : > { %s926_s18 = sadd.s32 1, %s876_s15   ;;  %s91_s19 = sadd.s32 1, %s872_s14 }
   0x5   : > { %s88_s20 = ssub.s32 %s876_s15, %s926_s18  ;;  %p101_p0 = scmp.ne.s32.totalorder %s872_s14, %s868_s13 }
   0x6   : > { %p89_p1 = scmp.eq.s32.totalorder %s88_s20, 0  ;;  %p102_p2 = scmp.eq.s32.totalorder %s922_s16, 1 }
   0x7   : > { %p107_p3 = scmp.ne.s32.totalorder %s868_s13, %s864_s12  ;;  %p108_p4 = scmp.eq.s32.totalorder %s645_s17, 1 }
   0x8   : > { %s937_s21 = scalar_select %p89_p1, %s872_s14, %s91_s19  }
   0x9   : > { %p939_p5 = por %p102_p2, %p101_p0  ;;  %p943_p6 = por %p108_p4, %p107_p3 }
   0xa   : > { %p648_p7 = scmp.ge.s32.totalorder %s876_s15, 1  ;;  %p142_p8 = scmp.lt.s32.totalorder %s876_s15, 3 }
   0xc   : > { %p143_p9 = pnand %p648_p7, %p142_p8 }
   0xd   : > { %s650_s24 = sshll.u32 (!%p143_p9), %s922_s16, 3  ;;  %v782_v16 = vld [vmem:[%s1186_s1 + $0x40] sm:$0xff] (!%p143_p9)   ;;  %s684_s30 = sshll.u32 (!%p143_p9), %s922_s16, 10 }
   0xe   : > { %146 = sbr.rel (%p143_p9) target bundleno = 610 (0x262), region = 32  ;;  %p168_p10 = scmp.lt.s32.totalorder (!%p143_p9), %s650_s24, 15  ;;  %v783_v17 = vld [vmem:[%s1186_s1] sm:$0xff] (!%p143_p9)   ;;  %685 = vmatprep.subr.bf16.mxu0 (!%p143_p9), %v782_v16  ;;  %725 = vmatprep.subr.bf16.mxu1 (!%p143_p9), %v782_v16  ;;  %v786_v16 = vld [vmem:[%s1186_s1 + $0x50] sm:$0xff] (!%p143_p9)  }
   0xf   : > { %686 = vmatpush3.bf16.msra.mxu0 (!%p143_p9), %v783_v17  ;;  %733 = vmatpush3.bf16.msra.mxu1 (!%p143_p9), %v783_v17  ;;  %v787_v17 = vld [vmem:[%s1186_s1 + $0x10] sm:$0xff] (!%p143_p9)   ;;  %s1136_s7 = scalar_lea.hbm (!%p143_p9), %s1188_s3, %s684_s30  ;;  %s878_s9 = smov (!%p143_p9), [#allocation2]  }
  0x10   : > { %s818_s10 = sshll.u32 (!%p143_p9), %s878_s9, 4  ;;  %s819_s10 = int_to_ptr.vmem [resolvable:$false] %s818_s10 }
  0x11   : > { %s820_s11 = scalar_lea.vmem (!%p143_p9), %s819_s10, 2048 }
  0x15   : > { %s1196_s24 = smov (!%p168_p10, %s650_s24), 15 }
  0x16   : > { %s683_s25 = sshll.u32 %s1196_s24, 4 }
  0x17   : > { %s172_s28 = scalar_lea.vmem %s1185_s0, %s683_s25  ;;  %s164_s25 = sand.u32 1, %s868_s13  }
  0x18   : > { %v953_v0 = vld [vmem:[%s172_s28 + $0x40] sm:$0xff]  ;;  %v181_v2 = vld [vmem:[%s172_s28 + $0x50] sm:$0xff]  ;;  %v654_v4 = vld [vmem:[%s172_s28 + $0x18] sm:$0xff]  ;;  %s649_s26 = sshll.u32 %s164_s25, 6  ;;  %s1144_s16 = scalar_lea.sflag [#allocation3], %s164_s25 }
  0x19   : > { %v176_v1 = vld [vmem:[%s172_s28] sm:$0xff]  ;;  %201 = vadd.xlane.f32.xlu1 %v953_v0  ;;  %v177_v3 = vld [vmem:[%s172_s28 + $0x10] sm:$0xff]  ;;  %v653_v5 = vld [vmem:[%s172_s28 + $0x8] sm:$0xff]  ;;  %s1123_s29 = scalar_lea.vmem [#allocation2], %s649_s26 }
  0x1a   : > { %193 = vadd.xlane.f32.xlu0 %v176_v1  ;;  %v658_v6 = vld [vmem:[%s172_s28 + $0x58] sm:$0xff]  ;;  %v657_v7 = vld [vmem:[%s172_s28 + $0x48] sm:$0xff]  ;;  %v956_v8 = vld [vmem:[%s172_s28 + $0x30] sm:$0xff]  ;;  %s583_s4 = sshll.u32 %s1123_s29, 4  ;;  %s1138_s4 = int_to_ptr.vmem [resolvable:$true] %s583_s4 }
  0x1b   : > { %v958_v9 = vld [vmem:[%s172_s28 + $0x20] sm:$0xff]  ;;  %v962_v10 = vld [vmem:[%s172_s28 + $0x70] sm:$0xff]  ;;  %v968_v12 = vld [vmem:[%s172_s28 + $0x38] sm:$0xff]  ;;  %s814_s8 = scalar_lea.vmem %s1138_s4, 1024  ;;  %p821_p0 = scmp.lt.s32.totalorder %s1138_s4, %s819_s10 }
  0x1c   : > { %v964_v11 = vld [vmem:[%s172_s28 + $0x60] sm:$0xff]  ;;  %v970_v13 = vld [vmem:[%s172_s28 + $0x28] sm:$0xff]  ;;  %v974_v14 = vld [vmem:[%s172_s28 + $0x78] sm:$0xff]  ;;  %p815_p11 = scmp.ne.s32.totalorder %s1138_s4, %s814_s8  ;;  %p822_p1 = scmp.lt.s32.totalorder %s820_s11, %s814_s8 }
  0x1d   : > { %203 = vadd.xlane.f32.xlu1 %v181_v2  ;;  %v976_v15 = vld [vmem:[%s172_s28 + $0x68] sm:$0xff] }
  0x1e   : > { %195 = vadd.xlane.f32.xlu0 %v177_v3  ;;  %p816_p12 = pnand %p815_p11, %p939_p5  ;;  %p823_p2 = por %p822_p1, %p821_p0 }
  0x20   : > { %p817_p13 = pneg %p816_p12 }
  0x21   : > { %211 = vadd.xlane.f32.xlu1 %v654_v4 }
  0x22   : > { %209 = vadd.xlane.f32.xlu0 %v653_v5  ;;  %p824_p3 = pnand %p823_p2, %p817_p13 }
  0x25   : > { %219 = vadd.xlane.f32.xlu1 %v658_v6 }
  0x26   : > { %217 = vadd.xlane.f32.xlu0 %v657_v7 }
  0x29   : > { %199 = vadd.xlane.f32.xlu1 %v956_v8 }
  0x2a   : > { %197 = vadd.xlane.f32.xlu0 %v958_v9 }
  0x2d   : > { %207 = vadd.xlane.f32.xlu1 %v962_v10 }
  0x2e   : > { %205 = vadd.xlane.f32.xlu0 %v964_v11 }
  0x31   : > { %215 = vadd.xlane.f32.xlu1 %v968_v12 }
  0x32   : > { %213 = vadd.xlane.f32.xlu0 %v970_v13 }
  0x35   : > { %223 = vadd.xlane.f32.xlu1 %v974_v14 }
  0x36   : > { %221 = vadd.xlane.f32.xlu0 %v976_v15 }
  0xa6   : > { %v202_v18 = vpop.xlane.xlu1 %201 }
  0xa7   : > { %v194_v19 = vpop.xlane.xlu0 %193 }
  0xaa   : > { %v204_v20 = vpop.xlane.xlu1 %203 }
  0xab   : > { %v196_v21 = vpop.xlane.xlu0 %195 }
  0xae   : > { %v212_v22 = vpop.xlane.xlu1 %211 }
  0xaf   : > { %v210_v23 = vpop.xlane.xlu0 %209  ;;  %v226_v24 = vadd.f32 %v212_v22, %v196_v21 }
  0xb0   : > { %v225_v25 = vadd.f32 %v210_v23, %v194_v19  ;;  %v789_v23 = vld [vmem:[%s1186_s1 + $0x18] sm:$0xff]  }
  0xb1   : > { %v234_v26 = vmul.f32 0.00390625, %v226_v24  ;;  %v790_v24 = vld [vmem:[%s1186_s1 + $0x60] sm:$0xff]  }
  0xb2   : > { %v233_v27 = vmul.f32 0.00390625, %v225_v25  ;;  %v220_v28 = vpop.xlane.xlu1 %219  ;;  %v791_v25 = vld [vmem:[%s1186_s1 + $0x20] sm:$0xff]  }
  0xb3   : > { %v218_v29 = vpop.xlane.xlu0 %217  ;;  %v986_v30 = vsub.f32 %v177_v3, %v234_v26  ;;  %v230_v32 = vadd.f32 %v220_v28, %v204_v20  ;;  %v999_v42 = vsub.f32 %v654_v4, %v234_v26  ;;  %v785_v3 = vld [vmem:[%s1186_s1 + $0x8] sm:$0xff]   ;;  %v794_v28 = vld [vmem:[%s1186_s1 + $0x70] sm:$0xff]  }
  0xb4   : > { %v988_v31 = vsub.f32 %v176_v1, %v233_v27  ;;  %v229_v33 = vadd.f32 %v218_v29, %v202_v18  ;;  %v1001_v43 = vsub.f32 %v653_v5, %v233_v27  ;;  %v792_v26 = vld [vmem:[%s1186_s1 + $0x68] sm:$0xff]   ;;  %v795_v29 = vld [vmem:[%s1186_s1 + $0x30] sm:$0xff]  }
  0xb5   : > { %v258_v34 = vmul.f32 %v986_v30, %v986_v30  ;;  %v238_v36 = vmul.f32 0.00390625, %v230_v32  ;;  %v282_v52 = vmul.f32 %v999_v42, %v999_v42  ;;  %v793_v27 = vld [vmem:[%s1186_s1 + $0x28] sm:$0xff]   ;;  %v796_v32 = vld [vmem:[%s1186_s1 + $0x78] sm:$0xff]  }
  0xb6   : > { %v257_v35 = vmul.f32 %v988_v31, %v988_v31  ;;  %v237_v37 = vmul.f32 0.00390625, %v229_v33  ;;  %v200_v38 = vpop.xlane.xlu1 %199  ;;  %v281_v53 = vmul.f32 %v1001_v43, %v1001_v43  ;;  %v797_v33 = vld [vmem:[%s1186_s1 + $0x38] sm:$0xff]  }
  0xb7   : > { %v198_v39 = vpop.xlane.xlu0 %197  ;;  %267 = vadd.xlane.f32.xlu1 %v258_v34  ;;  %v994_v40 = vsub.f32 %v181_v2, %v238_v36  ;;  %v1007_v48 = vsub.f32 %v658_v6, %v238_v36  ;;  %v784_v2 = vld [vmem:[%s1186_s1 + $0x48] sm:$0xff]  }
  0xb8   : > { %265 = vadd.xlane.f32.xlu0 %v257_v35  ;;  %v997_v41 = vsub.f32 %v953_v0, %v237_v37  ;;  %v1009_v49 = vsub.f32 %v657_v7, %v237_v37  ;;  %687 = vmatprep.subr.bf16.mxu0 %v784_v2 }
  0xb9   : > { %v262_v46 = vmul.f32 %v994_v40, %v994_v40  ;;  %v286_v60 = vmul.f32 %v1007_v48, %v1007_v48  ;;  %726 = vmatprep.subr.bf16.mxu1 %v784_v2  ;;  %688 = vmatpush3.bf16.msra.mxu0 %v785_v3 }
  0xba   : > { %v208_v44 = vpop.xlane.xlu1 %207  ;;  %v261_v47 = vmul.f32 %v997_v41, %v997_v41  ;;  %v285_v61 = vmul.f32 %v1009_v49, %v1009_v49  ;;  %734 = vmatpush3.bf16.msra.mxu1 %v785_v3  ;;  %689 = vmatprep.subr.bf16.mxu0 %v786_v16 }
  0xbb   : > { %v206_v45 = vpop.xlane.xlu0 %205  ;;  %275 = vadd.xlane.f32.xlu1 %v262_v46  ;;  %727 = vmatprep.subr.bf16.mxu1 %v786_v16 }
  0xbc   : > { %273 = vadd.xlane.f32.xlu0 %v261_v47 }
  0xbd   : > { %690 = vmatpush3.bf16.msra.mxu0 %v787_v17 }
  0xbe   : > { %v216_v50 = vpop.xlane.xlu1 %215  ;;  %735 = vmatpush3.bf16.msra.mxu1 %v787_v17 }
  0xbf   : > { %v214_v51 = vpop.xlane.xlu0 %213  ;;  %v228_v54 = vadd.f32 %v216_v50, %v200_v38  ;;  %291 = vadd.xlane.f32.xlu1 %v282_v52 }
  0xc0   : > { %v227_v55 = vadd.f32 %v214_v51, %v198_v39  ;;  %289 = vadd.xlane.f32.xlu0 %v281_v53 }
  0xc1   : > { %v236_v56 = vmul.f32 0.00390625, %v228_v54 }
  0xc2   : > { %v235_v57 = vmul.f32 0.00390625, %v227_v55  ;;  %v224_v58 = vpop.xlane.xlu1 %223 }
  0xc3   : > { %v222_v59 = vpop.xlane.xlu0 %221  ;;  %v1020_v62 = vsub.f32 %v956_v8, %v236_v56  ;;  %v232_v0 = vadd.f32 %v224_v58, %v208_v44  ;;  %299 = vadd.xlane.f32.xlu1 %v286_v60  ;;  %v1048_v18 = vsub.f32 %v968_v12, %v236_v56 }
  0xc4   : > { %v1023_v63 = vsub.f32 %v958_v9, %v235_v57  ;;  %v231_v1 = vadd.f32 %v222_v59, %v206_v45  ;;  %297 = vadd.xlane.f32.xlu0 %v285_v61  ;;  %v1055_v19 = vsub.f32 %v970_v13, %v235_v57  ;;  %v788_v13 = vld [vmem:[%s1186_s1 + $0x58] sm:$0xff]  }
  0xc5   : > { %v260_v4 = vmul.f32 %v1020_v62, %v1020_v62  ;;  %v240_v6 = vmul.f32 0.00390625, %v232_v0  ;;  %v284_v12 = vmul.f32 %v1048_v18, %v1048_v18  ;;  %691 = vmatprep.subr.bf16.mxu0 %v788_v13  ;;  %728 = vmatprep.subr.bf16.mxu1 %v788_v13 }
  0xc6   : > { %v259_v5 = vmul.f32 %v1023_v63, %v1023_v63  ;;  %v239_v7 = vmul.f32 0.00390625, %v231_v1  ;;  %v283_v22 = vmul.f32 %v1055_v19, %v1055_v19  ;;  %692 = vmatpush3.bf16.msra.mxu0 %v789_v23  ;;  %736 = vmatpush3.bf16.msra.mxu1 %v789_v23 }
  0xc7   : > { %v1036_v8 = vsub.f32 %v962_v10, %v240_v6  ;;  %271 = vadd.xlane.f32.xlu1 %v260_v4  ;;  %v1058_v20 = vsub.f32 %v974_v14, %v240_v6  ;;  %693 = vmatprep.subr.bf16.mxu0 %v790_v24 }
  0xc8   : > { %v1039_v9 = vsub.f32 %v964_v11, %v239_v7  ;;  %269 = vadd.xlane.f32.xlu0 %v259_v5  ;;  %v1063_v21 = vsub.f32 %v976_v15, %v239_v7  ;;  %729 = vmatprep.subr.bf16.mxu1 %v790_v24 }
  0xc9   : > { %v264_v10 = vmul.f32 %v1036_v8, %v1036_v8  ;;  %v288_v14 = vmul.f32 %v1058_v20, %v1058_v20 }
  0xca   : > { %v263_v11 = vmul.f32 %v1039_v9, %v1039_v9  ;;  %v287_v15 = vmul.f32 %v1063_v21, %v1063_v21  ;;  %694 = vmatpush3.bf16.msra.mxu0 %v791_v25  ;;  %737 = vmatpush3.bf16.msra.mxu1 %v791_v25 }
  0xcb   : > { %279 = vadd.xlane.f32.xlu1 %v264_v10  ;;  %695 = vmatprep.subr.bf16.mxu0 %v792_v26 }
  0xcc   : > { %277 = vadd.xlane.f32.xlu0 %v263_v11  ;;  %730 = vmatprep.subr.bf16.mxu1 %v792_v26 }
  0xce   : > { %696 = vmatpush3.bf16.msra.mxu0 %v793_v27  ;;  %738 = vmatpush3.bf16.msra.mxu1 %v793_v27 }
  0xcf   : > { %295 = vadd.xlane.f32.xlu1 %v284_v12  ;;  %697 = vmatprep.subr.bf16.mxu0 %v794_v28 }
  0xd0   : > { %293 = vadd.xlane.f32.xlu0 %v283_v22  ;;  %731 = vmatprep.subr.bf16.mxu1 %v794_v28 }
  0xd2   : > { %698 = vmatpush3.bf16.msra.mxu0 %v795_v29  ;;  %739 = vmatpush3.bf16.msra.mxu1 %v795_v29 }
  0xd3   : > { %303 = vadd.xlane.f32.xlu1 %v288_v14  ;;  %699 = vmatprep.subr.bf16.mxu0 %v796_v32 }
  0xd4   : > { %301 = vadd.xlane.f32.xlu0 %v287_v15  ;;  %732 = vmatprep.subr.bf16.mxu1 %v796_v32 }
  0xd6   : > { %700 = vmatpush3.bf16.msra.mxu0 %v797_v33  ;;  %740 = vmatpush3.bf16.msra.mxu1 %v797_v33 }
 0x144   : > { %v268_v34 = vpop.xlane.xlu1 %267 }
 0x145   : > { %v266_v35 = vpop.xlane.xlu0 %265 }
 0x148   : > { %v276_v36 = vpop.xlane.xlu1 %275 }
 0x149   : > { %v274_v37 = vpop.xlane.xlu0 %273 }
 0x14c   : > { %v292_v38 = vpop.xlane.xlu1 %291 }
 0x14d   : > { %v290_v39 = vpop.xlane.xlu0 %289  ;;  %v306_v44 = vadd.f32 %v292_v38, %v268_v34 }
 0x14e   : > { %v305_v45 = vadd.f32 %v290_v39, %v266_v35 }
 0x14f   : > { %v314_v46 = vmul.f32 0.00390625, %v306_v44 }
 0x150   : > { %v313_v47 = vmul.f32 0.00390625, %v305_v45  ;;  %v300_v50 = vpop.xlane.xlu1 %299 }
 0x151   : > { %v298_v51 = vpop.xlane.xlu0 %297  ;;  %v322_v52 = vadd.f32 1e-05, %v314_v46  ;;  %v310_v54 = vadd.f32 %v300_v50, %v276_v36 }
 0x152   : > { %v321_v53 = vadd.f32 1e-05, %v313_v47  ;;  %v309_v55 = vadd.f32 %v298_v51, %v274_v37 }
 0x153   : > { %798 = vrsqrt.f32 %v322_v52  ;;  %v318_v56 = vmul.f32 0.00390625, %v310_v54 }
 0x154   : > { %v317_v57 = vmul.f32 0.00390625, %v309_v55  ;;  %800 = vrsqrt.f32 %v321_v53  ;;  %v272_v58 = vpop.xlane.xlu1 %271 }
 0x155   : > { %v326_v59 = vadd.f32 1e-05, %v318_v56  ;;  %v270_v61 = vpop.xlane.xlu0 %269 }
 0x156   : > { %v325_v60 = vadd.f32 1e-05, %v317_v57 }
 0x157   : > { %802 = vrsqrt.f32 %v326_v59 }
 0x158   : > { %804 = vrsqrt.f32 %v325_v60  ;;  %v280_v0 = vpop.xlane.xlu1 %279 }
 0x159   : > { %v278_v1 = vpop.xlane.xlu0 %277 }
 0x15c   : > { %v296_v2 = vpop.xlane.xlu1 %295 }
 0x15d   : > { %v799_v3 = vpop.eup %798  ;;  %v308_v4 = vadd.f32 %v296_v2, %v272_v58  ;;  %v294_v5 = vpop.xlane.xlu0 %293 }
 0x15e   : > { %v801_v6 = vpop.eup %800  ;;  %v307_v7 = vadd.f32 %v294_v5, %v270_v61  ;;  %v346_v16 = vmul.f32 %v799_v3, %v999_v42  ;;  %v338_v17 = vmul.f32 %v799_v3, %v986_v30 }
 0x15f   : > { %v316_v10 = vmul.f32 0.00390625, %v308_v4  ;;  %v345_v11 = vmul.f32 %v801_v6, %v1001_v43  ;;  %v337_v12 = vmul.f32 %v801_v6, %v988_v31 }
 0x160   : > { %v315_v22 = vmul.f32 0.00390625, %v307_v7  ;;  %v304_v13 = vpop.xlane.xlu1 %303 }
 0x161   : > { %v803_v23 = vpop.eup %802  ;;  %v324_v14 = vadd.f32 1e-05, %v316_v10  ;;  %v312_v15 = vadd.f32 %v304_v13, %v280_v0  ;;  %v302_v24 = vpop.xlane.xlu0 %301  ;;  %v354_v25 = vpack.c.bf16 %v346_v16, %v345_v11  ;;  %v353_v26 = vpack.c.bf16 %v338_v17, %v337_v12 }
 0x162   : > { %v805_v27 = vpop.eup %804  ;;  %v323_v28 = vadd.f32 1e-05, %v315_v22  ;;  %v311_v29 = vadd.f32 %v302_v24, %v278_v1  ;;  %v350_v42 = vmul.f32 %v803_v23, %v1007_v48  ;;  %v342_v30 = vmul.f32 %v803_v23, %v994_v40 }
 0x163   : > { %806 = vrsqrt.f32 %v324_v14  ;;  %v320_v32 = vmul.f32 0.00390625, %v312_v15  ;;  %528 = vmatprep.mubr.bf16.mxu0 %v354_v25  ;;  %v349_v31 = vmul.f32 %v805_v27, %v1009_v49  ;;  %v341_v43 = vmul.f32 %v805_v27, %v997_v41 }
 0x164   : > { %808 = vrsqrt.f32 %v323_v28  ;;  %v319_v33 = vmul.f32 0.00390625, %v311_v29  ;;  %529 = vmatmul.mubr.bf16.vlgmr.msra.gmra.mrb[0].mxu0 %v353_v26 }
 0x165   : > { %v328_v34 = vadd.f32 1e-05, %v320_v32  ;;  %v358_v35 = vpack.c.bf16 %v350_v42, %v349_v31  ;;  %v357_v36 = vpack.c.bf16 %v342_v30, %v341_v43 }
 0x166   : > { %v327_v37 = vadd.f32 1e-05, %v319_v33 }
 0x167   : > { %810 = vrsqrt.f32 %v328_v34  ;;  %544 = vmatprep.mubr.bf16.mxu1 %v358_v35 }
 0x168   : > { %812 = vrsqrt.f32 %v327_v37  ;;  %545 = vmatmul.mubr.bf16.vlgmr.msra.gmra.mrb[0].mxu1 %v357_v36 }
 0x16d   : > { %v807_v48 = vpop.eup %806 }
 0x16e   : > { %v809_v40 = vpop.eup %808  ;;  %v348_v38 = vmul.f32 %v807_v48, %v1048_v18  ;;  %v340_v39 = vmul.f32 %v807_v48, %v1020_v62 }
 0x16f   : > { %v347_v49 = vmul.f32 %v809_v40, %v1055_v19  ;;  %v339_v41 = vmul.f32 %v809_v40, %v1023_v63 }
 0x171   : > { %v811_v44 = vpop.eup %810  ;;  %v356_v45 = vpack.c.bf16 %v348_v38, %v347_v49  ;;  %v355_v46 = vpack.c.bf16 %v340_v39, %v339_v41 }
 0x172   : > { %v813_v47 = vpop.eup %812  ;;  %v352_v50 = vmul.f32 %v811_v44, %v1058_v20  ;;  %v344_v51 = vmul.f32 %v811_v44, %v1036_v8  ;;  %v661_v20 = vld [vmem:[%s1187_s2] ss:$0 sm:$0xff] }
 0x173   : > { %536 = vmatprep.mubr.bf16.mxu0 %v356_v45  ;;  %v351_v52 = vmul.f32 %v813_v47, %v1063_v21  ;;  %v343_v18 = vmul.f32 %v813_v47, %v1039_v9 }
 0x174   : > { %537 = vmatmul.mubr.bf16.gmra.mrb[4].mxu0 %v355_v46 }
 0x175   : > { %v360_v62 = vpack.c.bf16 %v352_v50, %v351_v52  ;;  %v359_v19 = vpack.c.bf16 %v344_v51, %v343_v18 }
 0x177   : > { %552 = vmatprep.mubr.bf16.mxu1 %v360_v62 }
 0x178   : > { %553 = vmatmul.mubr.bf16.gmra.mrb[4].mxu1 %v359_v19 }
 0x237   : > { %v701_v63 = vpop.f32.mrb[0].mxu0 }
 0x238   : > { %v702_v53 = vpop.f32.mrb[1].mxu0 }
 0x239   : > { %v703_v8 = vadd.f32 %v702_v53, %v701_v63  ;;  %v704_v54 = vpop.f32.mrb[2].mxu0 }
 0x23a   : > { %v705_v55 = vpop.f32.mrb[3].mxu0 }
 0x23b   : > { %v531_v21 = vadd.f32 %v703_v8, %v661_v20  ;;  %v706_v56 = vadd.f32 %v705_v55, %v704_v54  ;;  %v713_v9 = vpop.f32.mrb[0].mxu1 }
 0x23c   : > { %v714_v57 = vpop.f32.mrb[1].mxu1 }
 0x23d   : > { %561 = vst [vmem:[%s1123_s29] sm:$0xff] %v531_v21  ;;  %v534_v58 = vadd.f32 %v706_v56, %v661_v20  ;;  %v715_v59 = vadd.f32 %v714_v57, %v713_v9  ;;  %v716_v60 = vpop.f32.mrb[2].mxu1 }
 0x23e   : > { %v717_v61 = vpop.f32.mrb[3].mxu1 }
 0x23f   : > { %562 = vst [vmem:[%s1123_s29 + $0x8] sm:$0xff] %v534_v58  ;;  %v547_v0 = vadd.f32 %v715_v59, %v661_v20  ;;  %v718_v1 = vadd.f32 %v717_v61, %v716_v60 }
 0x241   : > { %565 = vst [vmem:[%s1123_s29 + $0x20] sm:$0xff] %v547_v0  ;;  %v550_v2 = vadd.f32 %v718_v1, %v661_v20 }
 0x243   : > { %566 = vst [vmem:[%s1123_s29 + $0x28] sm:$0xff] %v550_v2 }
 0x247   : > { %v707_v3 = vpop.f32.mrb[4].mxu0 }
 0x248   : > { %v708_v4 = vpop.f32.mrb[5].mxu0 }
 0x249   : > { %v709_v5 = vadd.f32 %v708_v4, %v707_v3  ;;  %v710_v6 = vpop.f32.mrb[6].mxu0 }
 0x24a   : > { %v711_v7 = vpop.f32.mrb[7].mxu0 }
 0x24b   : > { %v539_v16 = vadd.f32 %v709_v5, %v661_v20  ;;  %v712_v17 = vadd.f32 %v711_v7, %v710_v6  ;;  %v719_v10 = vpop.f32.mrb[4].mxu1 }
 0x24c   : > { %v720_v11 = vpop.f32.mrb[5].mxu1 }
 0x24d   : > { %563 = vst [vmem:[%s1123_s29 + $0x10] sm:$0xff] %v539_v16  ;;  %v542_v12 = vadd.f32 %v712_v17, %v661_v20  ;;  %v721_v22 = vadd.f32 %v720_v11, %v719_v10  ;;  %v722_v13 = vpop.f32.mrb[6].mxu1 }
 0x24e   : > { %v723_v23 = vpop.f32.mrb[7].mxu1 }
 0x24f   : > { %564 = vst [vmem:[%s1123_s29 + $0x18] sm:$0xff] %v542_v12  ;;  %v555_v14 = vadd.f32 %v721_v22, %v661_v20  ;;  %v724_v15 = vadd.f32 %v723_v23, %v722_v13 }
 0x251   : > { %567 = vst [vmem:[%s1123_s29 + $0x30] sm:$0xff] %v555_v14  ;;  %v558_v24 = vadd.f32 %v724_v15, %v661_v20 }
 0x253   : > { %568 = vst [vmem:[%s1123_s29 + $0x38] sm:$0xff] %v558_v24 }
 0x254   : > { %827 = shalt.err (!%p824_p3)
}
 0x255   : > { %s828_s17 = scalar_lea.hbm %s1136_s7, 1024  ;;  %s832_s24 = scalar_lea.hbm %s1188_s3, 2048 }
 0x256   : > { %p829_p4 = scmp.ne.s32.totalorder %s1136_s7, %s828_s17  ;;  %p833_p9 = scmp.lt.u32.totalorder %s1136_s7, %s1188_s3 }
 0x257   : > { %p834_p10 = scmp.lt.u32.totalorder %s832_s24, %s828_s17  ;;  %p836_p12 = scmp.lt.u32.totalorder %s828_s17, %s1136_s7 }
 0x258   : > { %p830_p7 = pnand %p829_p4, %p939_p5 }
 0x259   : > { %p835_p11 = por %p834_p10, %p833_p9 }
 0x25a   : > { %p831_p8 = pneg %p830_p7 }
 0x25b   : > { %p837_p13 = por %p836_p12, %p835_p11 }
 0x25d   : > { %p838_p0 = pnand %p837_p13, %p831_p8 }
 0x25f   : > { %841 = shalt.err (!%p838_p0)
}
 0x260   : > { %s879_s27 = smov 128   ;;  %s880_s28 = smov 8  }
 0x261   : > { %741 = dma.vmem_to_hbm [thread:$0]  (%p939_p5), %s1138_s4, 1024, %s1136_s7, %s1144_s16, %s879_s27, %s879_s27, %s880_s28  }
 0x262 PF: > { %p747_p1 = scmp.ge.s32.totalorder %s876_s15, 2  ;;  %s598_s29 = sand.u32 1, %s864_s12  }
 0x263   : > { %s599_s30 = scalar_lea.sflag [#allocation3], %s598_s29 }
 0x264   : > { %p744_p2 = pnand %p747_p1, %p943_p6 }
 0x266   : > { %859 = dma.done.wait (!%p744_p2), %s599_s30, 1024  }
 0x267   : > { %861 = vsyncadd (!%p744_p2), %s599_s30, 4294966272  ;;  %p13_p3 = scmp.ge.s32.totalorder %s926_s18, 4   ;;  %s1191_s12 = smov %s868_s13 }
 0x268   : > { %s1192_s13 = smov %s872_s14  ;;  %s1193_s14 = smov %s937_s21 }
 0x269   : > { %s1194_s15 = smov %s926_s18  ;;  %15 = sbr.rel (!%p13_p3) target bundleno = 3 (0x3), region = 68 }
 0x270   :  { %604 = vsyncpa [#allocation3], 1 }
 0x271   :  { %606 = vsyncpa [#allocation3 + $0x1], 1 }

</bundles_post_ra>
